<compile_context>
chip_gen: v5e
topology: v5e:2x2
jax: 0.10.0
libtpu: 0.0.40
codegen_flags: <defaults>
</compile_context>

<pallas_src>
from functools import partial

import jax
import jax.numpy as jnp
from jax.experimental import pallas as pl
from jax.experimental.pallas import tpu as pltpu


def _round_up(x, m):
    return (x + m - 1) // m * m


def conv3d_matmul_kernel(w_ref, p_ref, o_ref):
    # w_ref: (Cout, Kpad) bf16 — flattened conv weight, bias in column K.
    # p_ref: (Kpad, Mpad) bf16 — im2col patches (K on sublanes, M on lanes),
    #                            row K is 1.0 over the first M columns.
    # o_ref: (Cout, Mpad) f32  — channel-first output, lane-dense in M.
    o_ref[...] = jnp.dot(
        w_ref[...], p_ref[...], preferred_element_type=jnp.float32
    ).astype(o_ref.dtype)


@jax.jit
def conv3d_pallas(x_ncdhw, weight, bias):
    """x_ncdhw: (N, Cin, D, H, W); weight: (Cout, Cin, KD, KH, KW); bias: (Cout,)."""
    N, Cin, D, H, W = x_ncdhw.shape
    Cout, _, KD, KH, KW = weight.shape
    Do, Ho, Wo = D - KD + 1, H - KH + 1, W - KW + 1

    M = N * Do * Ho * Wo                      # batch folded into matmul M
    K = KD * KH * KW * Cin                    # contraction dim (im2col)
    Kpad = _round_up(K + 1, 128)              # +1 lane for the bias row
    Mpad = _round_up(M, 128)                  # unmasked lane-dense stores

    # --- plain-JAX glue (fused under jit): im2col directly in (K, M) layout ---
    taps = []
    for kd in range(KD):
        for kh in range(KH):
            for kw in range(KW):
                # (N, Cin, Do, Ho, Wo)
                taps.append(x_ncdhw[:, :, kd:kd + Do, kh:kh + Ho, kw:kw + Wo])
    patches = jnp.stack(taps, axis=0)                         # (T, N, Cin, Do, Ho, Wo)
    patches = jnp.transpose(patches, (0, 2, 1, 3, 4, 5))      # (T, Cin, N, Do, Ho, Wo)
    patches = patches.reshape(K, M)                           # K order = (kd, kh, kw, cin)
    patches = jnp.pad(patches, ((0, Kpad - K), (0, Mpad - M)))
    # Ones row for the bias lane (only over the real M columns).
    patches = patches.at[K, :M].set(1.0)                      # (Kpad, Mpad)

    # Weight flattened with matching (kd, kh, kw, cin) ordering; bias in col K.
    w_flat = jnp.transpose(weight, (0, 2, 3, 4, 1)).reshape(Cout, K)
    w_flat = jnp.pad(w_flat, ((0, 0), (0, Kpad - K)))
    w_flat = w_flat.at[:, K].set(bias)                        # (Cout, Kpad)

    # bf16 operands (MXU-native), f32 accumulation inside the kernel.
    w_bf = w_flat.astype(jnp.bfloat16)
    p_bf = patches.astype(jnp.bfloat16)

    cost = pl.CostEstimate(
        flops=2 * Cout * Kpad * Mpad,
        bytes_accessed=w_bf.size * 2 + p_bf.size * 2 + Cout * Mpad * 4,
        transcendentals=0,
    )

    out = pl.pallas_call(
        conv3d_matmul_kernel,
        out_shape=jax.ShapeDtypeStruct((Cout, Mpad), jnp.float32),
        grid_spec=pltpu.PrefetchScalarGridSpec(
            num_scalar_prefetch=0,
            grid=(1,),
            in_specs=[
                pl.BlockSpec((Cout, Kpad), lambda i: (0, 0)),
                pl.BlockSpec((Kpad, Mpad), lambda i: (0, 0)),
            ],
            out_specs=pl.BlockSpec((Cout, Mpad), lambda i: (0, 0)),
        ),
        compiler_params=pltpu.CompilerParams(
            dimension_semantics=("arbitrary",)),
        cost_estimate=cost,
    )(w_bf, p_bf)

    # Drop M padding, un-flatten, restore PyTorch NCDHW output layout.
    out = out[:, :M].reshape(Cout, N, Do, Ho, Wo)
    return jnp.transpose(out, (1, 0, 2, 3, 4)).astype(x_ncdhw.dtype)


if __name__ == "__main__":
    # Small shapes consistent with Conv3d(in_channels=4, out_channels=8, kernel_size=3)
    N, Cin, Cout, Ksz = 2, 4, 8, 3
    D = H = W = 8

    key = jax.random.PRNGKey(0)
    kx, kw, kb = jax.random.split(key, 3)

    x = jax.random.normal(kx, (N, Cin, D, H, W), dtype=jnp.float32)

    # Deterministic parameter init mimicking PyTorch's default Conv3d init
    # (uniform(-bound, bound), bound = 1/sqrt(fan_in)).
    fan_in = Cin * Ksz * Ksz * Ksz
    bound = 1.0 / (fan_in ** 0.5)
    weight = jax.random.uniform(kw, (Cout, Cin, Ksz, Ksz, Ksz),
                                minval=-bound, maxval=bound, dtype=jnp.float32)
    bias = jax.random.uniform(kb, (Cout,),
                              minval=-bound, maxval=bound, dtype=jnp.float32)

    out = conv3d_pallas(x, weight, bias)
    out = jax.block_until_ready(out)

    # Sanity check against XLA's conv (same semantics as torch.nn.Conv3d).
    # Tolerance loosened because the Pallas matmul uses bf16 operands
    # (f32 accumulation).
    ref = jax.lax.conv_general_dilated(
        x, weight, window_strides=(1, 1, 1), padding="VALID",
        dimension_numbers=("NCDHW", "OIDHW", "NCDHW"))
    ref = ref + bias[None, :, None, None, None]
    assert out.shape == (N, Cout, D - Ksz + 1, H - Ksz + 1, W - Ksz + 1)
    assert jnp.allclose(out, ref, atol=2e-2, rtol=2e-2)

    print("KERNEL_OK")
</pallas_src>

<mosaic_0001>
module attributes {stable_mosaic.version = 11 : i64} {
  func.func @conv3d_matmul_kernel(%arg0: i32, %arg1: memref<8x128xbf16, #tpu.memory_space<vmem>>, %arg2: memref<128x512xbf16, #tpu.memory_space<vmem>>, %arg3: memref<8x512xf32, #tpu.memory_space<vmem>>) attributes {dimension_semantics = [#tpu.dimension_semantics<arbitrary>], iteration_bounds = array<i64: 1>, scalar_prefetch = 0 : i64, scratch_operands = 0 : i64, tpu.core_type = #tpu.core_type<tc>, window_params = [{pipeline_mode = #tpu.pipeline_mode<synchronous>, transform_indices = @transform_0, window_bounds = array<i64: 8, 128>}, {pipeline_mode = #tpu.pipeline_mode<synchronous>, transform_indices = @transform_1, window_bounds = array<i64: 128, 512>}, {pipeline_mode = #tpu.pipeline_mode<synchronous>, transform_indices = @transform_2, window_bounds = array<i64: 8, 512>}]} {
    %c0 = arith.constant 0 : index
    %c0_0 = arith.constant 0 : index
    %0 = vector.load %arg1[%c0, %c0_0] : memref<8x128xbf16, #tpu.memory_space<vmem>>, vector<8x128xbf16>
    %c0_1 = arith.constant 0 : index
    %c0_2 = arith.constant 0 : index
    %1 = vector.load %arg2[%c0_1, %c0_2] : memref<128x512xbf16, #tpu.memory_space<vmem>>, vector<128x512xbf16>
    %cst = arith.constant dense<0.000000e+00> : vector<8x512xf32>
    %2 = tpu.matmul %0, %1, %cst {dimension_numbers = #tpu.dot_dimension_numbers<[1], [0], [0], [1], [0, 0, 1, 1], [], []>} : vector<8x128xbf16>, vector<128x512xbf16>, vector<8x512xf32> -> vector<8x512xf32>
    %c0_3 = arith.constant 0 : index
    %c0_4 = arith.constant 0 : index
    %3 = vector.load %arg3[%c0_3, %c0_4] : memref<8x512xf32, #tpu.memory_space<vmem>>, vector<8x512xf32>
    tpu.vector_store %arg3[%c0_3, %c0_4], %2 {strides = array<i32>} : memref<8x512xf32, #tpu.memory_space<vmem>>, vector<8x512xf32>,
    return
  }
  func.func @transform_0(%arg0: i32) -> (i32, i32) {
    %c0_i32 = arith.constant 0 : i32
    %c0_i32_0 = arith.constant 0 : i32
    %c0_i32_1 = arith.constant 0 : i32
    return %c0_i32, %c0_i32_0 : i32, i32
  }
  func.func @transform_1(%arg0: i32) -> (i32, i32) {
    %c0_i32 = arith.constant 0 : i32
    %c0_i32_0 = arith.constant 0 : i32
    %c0_i32_1 = arith.constant 0 : i32
    return %c0_i32, %c0_i32_0 : i32, i32
  }
  func.func @transform_2(%arg0: i32) -> (i32, i32) {
    %c0_i32 = arith.constant 0 : i32
    %c0_i32_0 = arith.constant 0 : i32
    %c0_i32_1 = arith.constant 0 : i32
    return %c0_i32, %c0_i32_0 : i32, i32
  }
}

</mosaic_0001>

<bundles_post_ra>
// kernel: conv3d_pallas.1
= control target key start
LH: loop header
LB: loop body
LE: loop exit
PB: predicated region body
PF: predicated region fallthrough
CT: control target
= control target key end

     0   :  { %s646_s1 = inlined_call_operand.vmem [shape: bf16[128,512], index: 1, kind: input, shape index: {}]   ;;  %s647_s0 = inlined_call_operand.vmem [shape: bf16[8,128], index: 0, kind: input, shape index: {}]   ;;  %s648_s2 = inlined_call_operand.vmem [shape: f32[8,512], index: 2, kind: output, shape index: {}]  }
   0x1   :  { %v378_v0 = vld [vmem:[%s646_s1 + $0xe0] sm:$0xf]  ;;  %v422_v1 = vld [vmem:[%s646_s1 + $0xec] sm:$0xf0]  ;;  %v420_v2 = vld [vmem:[%s646_s1 + $0xe4] sm:$0xf] }
   0x2   :  { %v379_v3 = vor.u32 %v422_v1, %v378_v0  ;;  %v380_v4 = vld [vmem:[%s646_s1 + $0xf0] sm:$0xf0]  ;;  %v386_v5 = vld [vmem:[%s646_s1 + $0xe8] sm:$0xf]  ;;  %v423_v6 = vld [vmem:[%s646_s1 + $0xf4] sm:$0xf0] }
   0x3   :  { %v383_v7 = vor.u32 %v420_v2, %v380_v4  ;;  %v387_v8 = vor.u32 %v423_v6, %v386_v5  ;;  %v421_v9 = vld [vmem:[%s646_s1 + $0xec] sm:$0xf]  ;;  %v388_v10 = vld [vmem:[%s646_s1 + $0xf8] sm:$0xf0]  ;;  %v362_v11 = vld [vmem:[%s646_s1 + $0xc0] sm:$0xf] }
   0x4   :  { %204 = vmatpush.bf16.msra.mxu0 %v379_v3  ;;  %v391_v12 = vor.u32 %v421_v9, %v388_v10  ;;  %v418_v13 = vld [vmem:[%s646_s1 + $0xcc] sm:$0xf0]  ;;  %v416_v14 = vld [vmem:[%s646_s1 + $0xc4] sm:$0xf]  ;;  %v364_v15 = vld [vmem:[%s646_s1 + $0xd0] sm:$0xf0] }
   0x5   :  { %217 = vmatpush.bf16.msra.mxu1 %v383_v7  ;;  %230 = vmatpush.bf16.msra.mxu2 %v387_v8  ;;  %v363_v16 = vor.u32 %v418_v13, %v362_v11  ;;  %v367_v17 = vor.u32 %v416_v14, %v364_v15  ;;  %v370_v18 = vld [vmem:[%s646_s1 + $0xc8] sm:$0xf]  ;;  %v419_v19 = vld [vmem:[%s646_s1 + $0xd4] sm:$0xf0]  ;;  %v417_v20 = vld [vmem:[%s646_s1 + $0xcc] sm:$0xf] }
   0x6   :  { %243 = vmatpush.bf16.msra.mxu3 %v391_v12  ;;  %v371_v21 = vor.u32 %v419_v19, %v370_v18  ;;  %v372_v22 = vld [vmem:[%s646_s1 + $0xd8] sm:$0xf0]  ;;  %v346_v23 = vld [vmem:[%s646_s1 + $0xa0] sm:$0xf]  ;;  %v414_v24 = vld [vmem:[%s646_s1 + $0xac] sm:$0xf0] }
   0x7   :  { %v375_v25 = vor.u32 %v417_v20, %v372_v22  ;;  %v412_v26 = vld [vmem:[%s646_s1 + $0xa4] sm:$0xf]  ;;  %v348_v27 = vld [vmem:[%s646_s1 + $0xb0] sm:$0xf0]  ;;  %v354_v28 = vld [vmem:[%s646_s1 + $0xa8] sm:$0xf]  ;;  %v347_v29 = vor.u32 %v414_v24, %v346_v23 }
   0x8   :  { %205 = vmatpush.bf16.msra.mxu0 %v363_v16  ;;  %v415_v30 = vld [vmem:[%s646_s1 + $0xb4] sm:$0xf0]  ;;  %v413_v31 = vld [vmem:[%s646_s1 + $0xac] sm:$0xf]  ;;  %v356_v32 = vld [vmem:[%s646_s1 + $0xb8] sm:$0xf0]  ;;  %v351_v33 = vor.u32 %v412_v26, %v348_v27 }
   0x9   :  { %218 = vmatpush.bf16.msra.mxu1 %v367_v17  ;;  %231 = vmatpush.bf16.msra.mxu2 %v371_v21  ;;  %v355_v34 = vor.u32 %v415_v30, %v354_v28  ;;  %v330_v35 = vld [vmem:[%s646_s1 + $0x80] sm:$0xf]  ;;  %v410_v36 = vld [vmem:[%s646_s1 + $0x8c] sm:$0xf0]  ;;  %v408_v37 = vld [vmem:[%s646_s1 + $0x84] sm:$0xf]  ;;  %v359_v38 = vor.u32 %v413_v31, %v356_v32 }
   0xa   :  { %244 = vmatpush.bf16.msra.mxu3 %v375_v25  ;;  %v332_v39 = vld [vmem:[%s646_s1 + $0x90] sm:$0xf0]  ;;  %v338_v40 = vld [vmem:[%s646_s1 + $0x88] sm:$0xf]  ;;  %v411_v41 = vld [vmem:[%s646_s1 + $0x94] sm:$0xf0]  ;;  %v331_v44 = vor.u32 %v410_v36, %v330_v35 }
   0xb   :  { %v409_v42 = vld [vmem:[%s646_s1 + $0x8c] sm:$0xf]  ;;  %v340_v43 = vld [vmem:[%s646_s1 + $0x98] sm:$0xf0]  ;;  %v335_v45 = vor.u32 %v408_v37, %v332_v39  ;;  %v339_v46 = vor.u32 %v411_v41, %v338_v40  ;;  %v314_v47 = vld [vmem:[%s646_s1 + $0x60] sm:$0xf] }
   0xc   :  { %206 = vmatpush.bf16.msra.mxu0 %v347_v29  ;;  %v406_v48 = vld [vmem:[%s646_s1 + $0x6c] sm:$0xf0]  ;;  %v404_v49 = vld [vmem:[%s646_s1 + $0x64] sm:$0xf]  ;;  %v343_v50 = vor.u32 %v409_v42, %v340_v43  ;;  %v316_v51 = vld [vmem:[%s646_s1 + $0x70] sm:$0xf0] }
   0xd   :  { %219 = vmatpush.bf16.msra.mxu1 %v351_v33  ;;  %232 = vmatpush.bf16.msra.mxu2 %v355_v34  ;;  %v322_v52 = vld [vmem:[%s646_s1 + $0x68] sm:$0xf]  ;;  %v407_v53 = vld [vmem:[%s646_s1 + $0x74] sm:$0xf0]  ;;  %v405_v54 = vld [vmem:[%s646_s1 + $0x6c] sm:$0xf]  ;;  %v315_v56 = vor.u32 %v406_v48, %v314_v47  ;;  %v319_v57 = vor.u32 %v404_v49, %v316_v51 }
   0xe   :  { %245 = vmatpush.bf16.msra.mxu3 %v359_v38  ;;  %v324_v55 = vld [vmem:[%s646_s1 + $0x78] sm:$0xf0]  ;;  %v323_v58 = vor.u32 %v407_v53, %v322_v52  ;;  %v298_v59 = vld [vmem:[%s646_s1 + $0x40] sm:$0xf]  ;;  %v402_v60 = vld [vmem:[%s646_s1 + $0x4c] sm:$0xf0] }
   0xf   :  { %v400_v61 = vld [vmem:[%s646_s1 + $0x44] sm:$0xf]  ;;  %v327_v62 = vor.u32 %v405_v54, %v324_v55  ;;  %v300_v63 = vld [vmem:[%s646_s1 + $0x50] sm:$0xf0]  ;;  %v306_v0 = vld [vmem:[%s646_s1 + $0x48] sm:$0xf]  ;;  %v299_v4 = vor.u32 %v402_v60, %v298_v59 }
  0x10   :  { %207 = vmatpush.bf16.msra.mxu0 %v331_v44  ;;  %v403_v1 = vld [vmem:[%s646_s1 + $0x54] sm:$0xf0]  ;;  %v401_v2 = vld [vmem:[%s646_s1 + $0x4c] sm:$0xf]  ;;  %v308_v3 = vld [vmem:[%s646_s1 + $0x58] sm:$0xf0]  ;;  %v303_v5 = vor.u32 %v400_v61, %v300_v63 }
  0x11   :  { %220 = vmatpush.bf16.msra.mxu1 %v335_v45  ;;  %233 = vmatpush.bf16.msra.mxu2 %v339_v46  ;;  %v307_v6 = vor.u32 %v403_v1, %v306_v0  ;;  %v282_v7 = vld [vmem:[%s646_s1 + $0x20] sm:$0xf]  ;;  %v398_v8 = vld [vmem:[%s646_s1 + $0x2c] sm:$0xf0]  ;;  %v396_v9 = vld [vmem:[%s646_s1 + $0x24] sm:$0xf]  ;;  %v311_v10 = vor.u32 %v401_v2, %v308_v3 }
  0x12   :  { %246 = vmatpush.bf16.msra.mxu3 %v343_v50  ;;  %v284_v11 = vld [vmem:[%s646_s1 + $0x30] sm:$0xf0]  ;;  %v290_v12 = vld [vmem:[%s646_s1 + $0x28] sm:$0xf]  ;;  %v399_v13 = vld [vmem:[%s646_s1 + $0x34] sm:$0xf0]  ;;  %v283_v16 = vor.u32 %v398_v8, %v282_v7 }
  0x13   :  { %v397_v14 = vld [vmem:[%s646_s1 + $0x2c] sm:$0xf]  ;;  %v292_v15 = vld [vmem:[%s646_s1 + $0x38] sm:$0xf0]  ;;  %v287_v17 = vor.u32 %v396_v9, %v284_v11  ;;  %v291_v18 = vor.u32 %v399_v13, %v290_v12  ;;  %v266_v19 = vld [vmem:[%s646_s1] sm:$0xf] }
  0x14   :  { %208 = vmatpush.bf16.msra.mxu0 %v315_v56  ;;  %v394_v20 = vld [vmem:[%s646_s1 + $0xc] sm:$0xf0]  ;;  %v392_v21 = vld [vmem:[%s646_s1 + $0x4] sm:$0xf]  ;;  %v295_v22 = vor.u32 %v397_v14, %v292_v15  ;;  %v268_v23 = vld [vmem:[%s646_s1 + $0x10] sm:$0xf0] }
  0x15   :  { %221 = vmatpush.bf16.msra.mxu1 %v319_v57  ;;  %234 = vmatpush.bf16.msra.mxu2 %v323_v58  ;;  %v274_v24 = vld [vmem:[%s646_s1 + $0x8] sm:$0xf]  ;;  %v395_v25 = vld [vmem:[%s646_s1 + $0x14] sm:$0xf0]  ;;  %v393_v26 = vld [vmem:[%s646_s1 + $0xc] sm:$0xf]  ;;  %v267_v28 = vor.u32 %v394_v20, %v266_v19  ;;  %v271_v29 = vor.u32 %v392_v21, %v268_v23 }
  0x16   :  { %247 = vmatpush.bf16.msra.mxu3 %v327_v62  ;;  %v276_v27 = vld [vmem:[%s646_s1 + $0x18] sm:$0xf0]  ;;  %v275_v30 = vor.u32 %v395_v25, %v274_v24  ;;  %v11_v32 = vld [vmem:[%s647_s0] sm:$0xf] }
  0x17   :  { %v279_v31 = vor.u32 %v393_v26, %v276_v27 }
  0x18   :  { %209 = vmatpush.bf16.msra.mxu0 %v299_v4 }
  0x19   :  { %222 = vmatpush.bf16.msra.mxu1 %v303_v5  ;;  %235 = vmatpush.bf16.msra.mxu2 %v307_v6 }
  0x1a   :  { %248 = vmatpush.bf16.msra.mxu3 %v311_v10 }
  0x1c   :  { %210 = vmatpush.bf16.msra.mxu0 %v283_v16 }
  0x1d   :  { %223 = vmatpush.bf16.msra.mxu1 %v287_v17  ;;  %236 = vmatpush.bf16.msra.mxu2 %v291_v18 }
  0x1e   :  { %249 = vmatpush.bf16.msra.mxu3 %v295_v22 }
  0x20   :  { %211 = vmatpush.bf16.msra.mxu0 %v267_v28 }
  0x21   :  { %224 = vmatpush.bf16.msra.mxu1 %v271_v29  ;;  %237 = vmatpush.bf16.msra.mxu2 %v275_v30 }
  0x22   :  { %250 = vmatpush.bf16.msra.mxu3 %v279_v31 }
  0x23   :  { %212 = vmatmul.bf16.vlgmr.msra.gmra.mxu0 %v11_v32 }
  0x24   :  { %225 = vmatmul.bf16.vlgmr.msra.gmra.mxu1 %v11_v32  ;;  %238 = vmatmul.bf16.vlgmr.msra.gmra.mxu2 %v11_v32 }
  0x25   :  { %251 = vmatmul.bf16.vlgmr.msra.gmra.mxu3 %v11_v32 }
  0xa0   :  { %v213_v33 = vpop.f32.mrf.mxu0 }
  0xa1   :  { %256 = vst [vmem:[%s648_s2] sm:$0xff] %v213_v33  ;;  %v226_v34 = vpop.f32.mrf.mxu1 }
  0xa2   :  { %257 = vst [vmem:[%s648_s2 + $0x8] sm:$0xff] %v226_v34 }
  0xa7   :  { %v239_v35 = vpop.f32.mrf.mxu2 }
  0xa8   :  { %258 = vst [vmem:[%s648_s2 + $0x10] sm:$0xff] %v239_v35  ;;  %v252_v36 = vpop.f32.mrf.mxu3  ;;  %v215_v37 = vpop.f32.mrf.mxu0 }
  0xa9   :  { %259 = vst [vmem:[%s648_s2 + $0x18] sm:$0xff] %v252_v36  ;;  %v228_v38 = vpop.f32.mrf.mxu1 }
  0xaf   :  { %v241_v39 = vpop.f32.mrf.mxu2 }
  0xb0   :  { %v254_v40 = vpop.f32.mrf.mxu3 }

</bundles_post_ra>
